<compile_context>
chip_gen: v6e
topology: v6e:2x2x1
jax: 0.10.0
libtpu: 0.0.40
codegen_flags: <defaults>
</compile_context>

<pallas_src>
import jax
import jax.numpy as jnp
from jax.experimental import pallas as pl
from jax.experimental.pallas import tpu as pltpu

_EPS = 1e-12


def _log_abs_kernel(x_ref, o_ref):
    # Compute in f32: on v5e the VPU/EUP have no native bf16 path so the
    # upcast happens anyway; doing it once per tile keeps the EUP log in f32
    # and preserves the +1e-12. No-op for f32 inputs.
    xf = x_ref[...].astype(jnp.float32)
    o_ref[...] = jnp.log(jnp.abs(xf) + _EPS).astype(o_ref.dtype)


def log_abs(x: jax.Array, *, tile_rows: int = 512, lane: int = 1024) -> jax.Array:
    """Computes log(|x| + 1e-12) elementwise via a Pallas TPU kernel.

    Design:
      - Flatten to a lane-dense (rows, 1024) slab; pad only to a multiple of
        1024 elements (= 8 * 128), with a pad==0 fast path so no extra HBM
        passes (concatenate/slice) occur for already-aligned sizes.
      - Block = (512, 1024) f32 = 2 MiB. With default double buffering that is
        ~8 MiB of VMEM for in+out, fitting v5e's 16 MiB default scoped VMEM and
        well under v6e/v7x limits.
      - Grid axis is "parallel" so v7x's two TensorCores split the blocks;
        inert (but free) on v5e/v6e.
      - Last block may be partial (masked writes). log(|x|+eps) is finite for
        any padding value, so out-of-bounds lanes are harmless.
    """
    orig_shape = x.shape
    orig_dtype = x.dtype

    flat = x.reshape(-1)
    n = flat.shape[0]

    pad = (-n) % lane
    if pad:
        # Pad value is irrelevant (sliced off below; never produces NaN).
        flat = jnp.concatenate([flat, jnp.ones((pad,), dtype=orig_dtype)])
    rows = (n + pad) // lane
    x2d = flat.reshape(rows, lane)

    # Don't let a block exceed the array; a full-extent block is always legal.
    block_rows = min(tile_rows, rows)
    grid = (pl.cdiv(rows, block_rows),)

    itemsize = jnp.dtype(orig_dtype).itemsize
    cost = pl.CostEstimate(
        flops=2 * n,            # abs + add
        transcendentals=n,      # log
        bytes_accessed=2 * n * itemsize,
    )

    out2d = pl.pallas_call(
        _log_abs_kernel,
        out_shape=jax.ShapeDtypeStruct((rows, lane), orig_dtype),
        grid_spec=pltpu.PrefetchScalarGridSpec(
            num_scalar_prefetch=0,
            grid=grid,
            in_specs=[pl.BlockSpec((block_rows, lane), lambda i: (i, 0))],
            out_specs=pl.BlockSpec((block_rows, lane), lambda i: (i, 0)),
        ),
        compiler_params=pltpu.CompilerParams(
            dimension_semantics=("parallel",),
        ),
        cost_estimate=cost,
    )(x2d)

    out = out2d.reshape(-1)
    if pad:
        out = out[:n]
    return out.reshape(orig_shape)


if __name__ == "__main__":
    key = jax.random.PRNGKey(0)
    # NCHW input, small shape consistent with a typical conv-style input.
    x = jax.random.normal(key, (2, 4, 16, 16), dtype=jnp.float32)

    y = log_abs(x)
    jax.block_until_ready(y)

    # Correctness check against plain JAX reference.
    ref = jnp.log(jnp.abs(x) + 1e-12)
    assert y.shape == x.shape and y.dtype == x.dtype
    assert jnp.allclose(y, ref, rtol=1e-6, atol=1e-6), "mismatch vs reference"

    print("KERNEL_OK")
</pallas_src>

<mosaic_0001>
module attributes {stable_mosaic.version = 11 : i64} {
  func.func @_log_abs_kernel(%arg0: i32, %arg1: memref<2x1024xf32, #tpu.memory_space<vmem>>, %arg2: memref<2x1024xf32, #tpu.memory_space<vmem>>) attributes {dimension_semantics = [#tpu.dimension_semantics<parallel>], iteration_bounds = array<i64: 1>, scalar_prefetch = 0 : i64, scratch_operands = 0 : i64, tpu.core_type = #tpu.core_type<tc>, window_params = [{transform_indices = @transform_0, window_bounds = array<i64: 2, 1024>}, {transform_indices = @transform_1, window_bounds = array<i64: 2, 1024>}]} {
    %c0 = arith.constant 0 : index
    %c0_0 = arith.constant 0 : index
    %0 = vector.load %arg1[%c0, %c0_0] : memref<2x1024xf32, #tpu.memory_space<vmem>>, vector<2x1024xf32>
    %1 = math.absf %0 : vector<2x1024xf32>
    %cst = arith.constant 9.99999996E-13 : f32
    %2 = vector.broadcast %cst : f32 to vector<2x1024xf32>
    %3 = arith.addf %1, %2 : vector<2x1024xf32>
    %4 = math.log %3 : vector<2x1024xf32>
    %c0_1 = arith.constant 0 : index
    %c0_2 = arith.constant 0 : index
    %5 = vector.load %arg2[%c0_1, %c0_2] : memref<2x1024xf32, #tpu.memory_space<vmem>>, vector<2x1024xf32>
    tpu.vector_store %arg2[%c0_1, %c0_2], %4 {strides = array<i32>} : memref<2x1024xf32, #tpu.memory_space<vmem>>, vector<2x1024xf32>,
    return
  }
  func.func @transform_0(%arg0: i32) -> (i32, i32) {
    %c0_i32 = arith.constant 0 : i32
    %c0_i32_0 = arith.constant 0 : i32
    return %arg0, %c0_i32 : i32, i32
  }
  func.func @transform_1(%arg0: i32) -> (i32, i32) {
    %c0_i32 = arith.constant 0 : i32
    %c0_i32_0 = arith.constant 0 : i32
    return %arg0, %c0_i32 : i32, i32
  }
}

</mosaic_0001>

<bundles_post_ra>
// kernel: tpu_custom_call.1
= control target key start
LH: loop header
LB: loop body
LE: loop exit
PB: predicated region body
PF: predicated region fallthrough
CT: control target
= control target key end

     0   :  { %6 = vsyncpa [#allocation3], 0  ;;  %s116_s0 = inlined_call_operand.hbm [shape: f32[2,1024], index: 0, kind: input, shape index: {}]   ;;  %s117_s1 = inlined_call_operand.hbm [shape: f32[2,1024], index: 1, kind: output, shape index: {}]  }
   0x1   :  { %7 = vsyncpa [#allocation4], 0  ;;  %s98_s6 = smov [#allocation2]  }
   0x2   :  { %s14_s7 = sshll.u32 %s98_s6, 4  ;;  %s15_s7 = int_to_ptr.vmem [resolvable:$true] %s14_s7 }
   0x3   :  { %s62_s8 = scalar_lea.vmem %s15_s7, 256  ;;  %p67_p1 = scmp.lt.s32.totalorder %s15_s7, %s15_s7 }
   0x4   :  { %p63_p0 = scmp.ne.s32.totalorder %s15_s7, %s62_s8  ;;  %p68_p2 = scmp.lt.s32.totalorder %s62_s8, %s62_s8 }
   0x6   :  { %p69_p3 = por %p68_p2, %p67_p1 }
   0x8   :  { %p70_p4 = pnand %p69_p3, %p63_p0 }
   0xa   :  { %73 = shalt.err (!%p70_p4)
}
   0xb   :  { %17 = dma.hbm_to_vmem [thread:$0]  %s116_s0, 256, %s15_s7, [#allocation3]  }
   0xc   :  { %94 = dma.done.wait [#allocation3], 256  }
   0xd   :  { %95 = vsyncadd [#allocation3], 4294967040  ;;  %v21_v0 = vld [vmem:[#allocation2] sm:$0xff]  ;;  %v22_v1 = vld [vmem:[#allocation2 + $0x8] sm:$0xff]  ;;  %s99_s11 = smov [#allocation5]  }
   0xe   :  { %v23_v2 = vand.u32 2147483647, %v21_v0  ;;  %v24_v3 = vand.u32 2147483647, %v22_v1  ;;  %s39_s12 = sshll.u32 %s99_s11, 4  ;;  %s40_s12 = int_to_ptr.vmem [resolvable:$true] %s39_s12 }
   0xf   :  { %s74_s0 = scalar_lea.vmem %s40_s12, 256  ;;  %p79_p6 = scmp.lt.s32.totalorder %s40_s12, %s40_s12 }
  0x10   :  { %v25_v4 = vadd.f32 1e-12, %v23_v2  ;;  %v26_v5 = vadd.f32 1e-12, %v24_v3  ;;  %p75_p5 = scmp.ne.s32.totalorder %s40_s12, %s74_s0  ;;  %p80_p7 = scmp.lt.s32.totalorder %s74_s0, %s74_s0 }
  0x12   :  { %50 = vlog2.f32 %v25_v4  ;;  %p81_p8 = por %p80_p7, %p79_p6 }
  0x13   :  { %52 = vlog2.f32 %v26_v5 }
  0x14   :  { %p82_p9 = pnand %p81_p8, %p75_p5 }
  0x1f   :  { %v51_v6 = vpop.eup %50 }
  0x20   :  { %v53_v7 = vpop.eup %52  ;;  %v28_v8 = vmul.f32 0.6931472, %v51_v6 }
  0x21   :  { %v30_v9 = vmul.f32 0.6931472, %v53_v7 }
  0x22   :  { %31 = vst [vmem:[#allocation5] sm:$0xff] %v28_v8 }
  0x23   :  { %32 = vst [vmem:[#allocation5 + $0x8] sm:$0xff] %v30_v9 }
  0x24   :  { %85 = shalt.err (!%p82_p9)
}
  0x25   :  { %42 = dma.vmem_to_hbm [thread:$0]  %s40_s12, 256, %s117_s1, [#allocation4]  }
  0x26   :  { %96 = dma.done.wait [#allocation4], 256  }
  0x27   :  { %97 = vsyncadd [#allocation4], 4294967040 }
  0x28   :  { %46 = vsyncpa [#allocation3], 1 }
  0x29   :  { %47 = vsyncpa [#allocation4], 1 }

</bundles_post_ra>
